<compile_context>
chip_gen: v6e
topology: v6e:2x2x1
jax: 0.10.0
libtpu: 0.0.40
codegen_flags: <defaults>
</compile_context>

<pallas_src>
import functools

import numpy as np
import jax
import jax.numpy as jnp
from jax.experimental import pallas as pl
from jax.experimental.pallas import tpu as pltpu

EPS = 1e-5     # torch.nn.BatchNorm2d default
LANE = 128     # TPU lane width


def _round_up(x, m):
    return (x + m - 1) // m * m


# --------------------------------------------------------------------------
# Pass 1: conv matmuls (bf16 in, f32 acc) + per-tile BN partial sums
# --------------------------------------------------------------------------
def _conv_stats_skip_kernel(patches_ref, xs_ref, w3_ref, w1_ref,
                            ym_ref, ys_ref, stats_ref):
    # main branch: im2col'ed 3x3 conv as one MXU matmul
    ym = jnp.dot(patches_ref[...], w3_ref[...], preferred_element_type=jnp.float32)
    # skip branch: strided 1x1 conv as a channel matmul
    ys = jnp.dot(xs_ref[...], w1_ref[...], preferred_element_type=jnp.float32)
    ym_ref[...] = ym
    ys_ref[...] = ys
    # per-tile per-channel partial sums for the cross-tile BN reduction
    stats_ref[0] = jnp.concatenate(
        [jnp.sum(ym, axis=0, keepdims=True),
         jnp.sum(ym * ym, axis=0, keepdims=True),
         jnp.sum(ys, axis=0, keepdims=True),
         jnp.sum(ys * ys, axis=0, keepdims=True)], axis=0)


def _conv_stats_identity_kernel(patches_ref, w3_ref, ym_ref, stats_ref):
    ym = jnp.dot(patches_ref[...], w3_ref[...], preferred_element_type=jnp.float32)
    ym_ref[...] = ym
    stats_ref[0] = jnp.concatenate(
        [jnp.sum(ym, axis=0, keepdims=True),
         jnp.sum(ym * ym, axis=0, keepdims=True)], axis=0)


# --------------------------------------------------------------------------
# Pass 2: finalize BN statistics + fused normalize + residual add
# --------------------------------------------------------------------------
def _bn_scale_shift(s_sum, s_sqsum, gamma, beta, inv_count):
    mean = s_sum * inv_count
    var = s_sqsum * inv_count - mean * mean          # biased variance
    scale = gamma * jax.lax.rsqrt(var + EPS)          # EUP rsqrt
    shift = beta - mean * scale
    return scale, shift


def _bn_residual_skip_kernel(stats_ref, gm_ref, bm_ref, gs_ref, bs_ref,
                             ym_ref, ys_ref, out_ref, *, inv_count):
    s = stats_ref[...]                                # (4, Cp): exact global sums
    scale_m, shift_m = _bn_scale_shift(s[0:1], s[1:2], gm_ref[...], bm_ref[...], inv_count)
    scale_s, shift_s = _bn_scale_shift(s[2:3], s[3:4], gs_ref[...], bs_ref[...], inv_count)
    out_ref[...] = (ym_ref[...] * scale_m + shift_m
                    + ys_ref[...] * scale_s + shift_s).astype(out_ref.dtype)


def _bn_residual_identity_kernel(stats_ref, gm_ref, bm_ref,
                                 ym_ref, id_ref, out_ref, *, inv_count):
    s = stats_ref[...]                                # (2, Cp)
    scale_m, shift_m = _bn_scale_shift(s[0:1], s[1:2], gm_ref[...], bm_ref[...], inv_count)
    out_ref[...] = (ym_ref[...] * scale_m + shift_m + id_ref[...]).astype(out_ref.dtype)


# --------------------------------------------------------------------------
# Wrapper
# --------------------------------------------------------------------------
def resnet_forward(x_nchw, params, stride, *, block_m=1024):
    """block_m: rows (of the flattened N*Ho*Wo dim) per grid step.
    Sized for v5e/v6e 128 MiB VMEM at real ResNet widths; halve it on v7x."""
    N, Cin, H, W = x_nchw.shape
    Cout = params["w3"].shape[-1]
    use_skip = (stride != 1) or (Cin != Cout)

    x = jnp.transpose(x_nchw, (0, 2, 3, 1)).astype(jnp.float32)   # NCHW -> NHWC
    Ho = (H + 2 - 3) // stride + 1
    Wo = (W + 2 - 3) // stride + 1
    M = N * Ho * Wo
    K = 9 * Cin

    Cp = _round_up(Cout, LANE)                        # lane-dense channels
    TM = _round_up(min(block_m, _round_up(M, 8)), 8)  # rows per tile
    M_pad = _round_up(M, TM)                          # zero rows -> contribute 0 to sums
    nt = M_pad // TM

    # im2col glue for the 3x3 / pad=1 / stride conv (bf16 halves the HBM slab).
    xp = jnp.pad(x, ((0, 0), (1, 1), (1, 1), (0, 0)))
    cols = [xp[:, kh:kh + Ho * stride:stride, kw:kw + Wo * stride:stride, :]
            for kh in range(3) for kw in range(3)]
    patches = jnp.concatenate(cols, axis=-1).reshape(M, K)
    patches = jnp.pad(patches, ((0, M_pad - M), (0, 0))).astype(jnp.bfloat16)

    w3f = jnp.pad(params["w3"].reshape(K, Cout), ((0, 0), (0, Cp - Cout))).astype(jnp.bfloat16)
    gm = jnp.pad(params["gm"], ((0, 0), (0, Cp - Cout)))
    bm = jnp.pad(params["bm"], ((0, 0), (0, Cp - Cout)))

    row_spec = lambda w: pl.BlockSpec((TM, w), lambda i: (i, 0))
    bcast_spec = lambda shape: pl.BlockSpec(shape, lambda i, _n=len(shape): (0,) * _n)
    cparams = pltpu.CompilerParams(dimension_semantics=("parallel",))

    if use_skip:
        xs = x[:, ::stride, ::stride, :].reshape(M, Cin)
        xs = jnp.pad(xs, ((0, M_pad - M), (0, 0))).astype(jnp.bfloat16)
        w1p = jnp.pad(params["w1"], ((0, 0), (0, Cp - Cout))).astype(jnp.bfloat16)
        gs = jnp.pad(params["gs"], ((0, 0), (0, Cp - Cout)))
        bs = jnp.pad(params["bs"], ((0, 0), (0, Cp - Cout)))

        ym, ys, part = pl.pallas_call(
            _conv_stats_skip_kernel,
            grid=(nt,),
            in_specs=[row_spec(K), row_spec(Cin),
                      bcast_spec((K, Cp)), bcast_spec((Cin, Cp))],
            out_specs=[row_spec(Cp), row_spec(Cp),
                       pl.BlockSpec((1, 4, Cp), lambda i: (i, 0, 0))],
            out_shape=[jax.ShapeDtypeStruct((M_pad, Cp), jnp.float32),
                       jax.ShapeDtypeStruct((M_pad, Cp), jnp.float32),
                       jax.ShapeDtypeStruct((nt, 4, Cp), jnp.float32)],
            compiler_params=cparams,
        )(patches, xs, w3f, w1p)

        stats = jnp.sum(part, axis=0)                 # (4, Cp) exact global BN sums

        out = pl.pallas_call(
            functools.partial(_bn_residual_skip_kernel, inv_count=1.0 / M),
            grid=(nt,),
            in_specs=[bcast_spec((4, Cp)),
                      bcast_spec((1, Cp)), bcast_spec((1, Cp)),
                      bcast_spec((1, Cp)), bcast_spec((1, Cp)),
                      row_spec(Cp), row_spec(Cp)],
            out_specs=row_spec(Cp),
            out_shape=jax.ShapeDtypeStruct((M_pad, Cp), jnp.float32),
            compiler_params=cparams,
        )(stats, gm, bm, gs, bs, ym, ys)
    else:
        ym, part = pl.pallas_call(
            _conv_stats_identity_kernel,
            grid=(nt,),
            in_specs=[row_spec(K), bcast_spec((K, Cp))],
            out_specs=[row_spec(Cp),
                       pl.BlockSpec((1, 2, Cp), lambda i: (i, 0, 0))],
            out_shape=[jax.ShapeDtypeStruct((M_pad, Cp), jnp.float32),
                       jax.ShapeDtypeStruct((nt, 2, Cp), jnp.float32)],
            compiler_params=cparams,
        )(patches, w3f)

        stats = jnp.sum(part, axis=0)                 # (2, Cp)
        # exact f32 identity path (Cin == Cout, stride == 1)
        ident = jnp.pad(x.reshape(M, Cout), ((0, M_pad - M), (0, Cp - Cout)))

        out = pl.pallas_call(
            functools.partial(_bn_residual_identity_kernel, inv_count=1.0 / M),
            grid=(nt,),
            in_specs=[bcast_spec((2, Cp)), bcast_spec((1, Cp)), bcast_spec((1, Cp)),
                      row_spec(Cp), row_spec(Cp)],
            out_specs=row_spec(Cp),
            out_shape=jax.ShapeDtypeStruct((M_pad, Cp), jnp.float32),
            compiler_params=cparams,
        )(stats, gm, bm, ym, ident)

    out = out[:M, :Cout].reshape(N, Ho, Wo, Cout)
    return jnp.transpose(out, (0, 3, 1, 2))           # back to NCHW


# ---------- pure-JAX reference (full-f32 HIGHEST precision, for correctness) ----------
def ref_forward(x_nchw, params, stride):
    N, Cin, H, W = x_nchw.shape
    Cout = params["w3"].shape[-1]
    x = jnp.transpose(x_nchw, (0, 2, 3, 1)).astype(jnp.float32)

    def bn_nhwc(y, gamma, beta):
        mean = jnp.mean(y, axis=(0, 1, 2), keepdims=True)
        var = jnp.mean((y - mean) ** 2, axis=(0, 1, 2), keepdims=True)
        return ((y - mean) * jax.lax.rsqrt(var + EPS)
                * gamma.reshape(1, 1, 1, -1) + beta.reshape(1, 1, 1, -1))

    main = jax.lax.conv_general_dilated(
        x, params["w3"], window_strides=(stride, stride),
        padding=((1, 1), (1, 1)), dimension_numbers=("NHWC", "HWIO", "NHWC"),
        precision=jax.lax.Precision.HIGHEST)
    main = bn_nhwc(main, params["gm"], params["bm"])

    if stride != 1 or Cin != Cout:
        skip = jax.lax.conv_general_dilated(
            x, params["w1"].reshape(1, 1, Cin, Cout),
            window_strides=(stride, stride), padding=((0, 0), (0, 0)),
            dimension_numbers=("NHWC", "HWIO", "NHWC"),
            precision=jax.lax.Precision.HIGHEST)
        skip = bn_nhwc(skip, params["gs"], params["bs"])
    else:
        skip = x
    return jnp.transpose(main + skip, (0, 3, 1, 2))


def init_params(key, cin, cout):
    k1, k2 = jax.random.split(key)
    w3 = jax.random.normal(k1, (3, 3, cin, cout), jnp.float32) * np.sqrt(2.0 / (9 * cin))
    w1 = jax.random.normal(k2, (cin, cout), jnp.float32) * np.sqrt(2.0 / cin)
    return dict(w3=w3,
                gm=jnp.ones((1, cout), jnp.float32), bm=jnp.zeros((1, cout), jnp.float32),
                w1=w1,
                gs=jnp.ones((1, cout), jnp.float32), bs=jnp.zeros((1, cout), jnp.float32))


if __name__ == "__main__":
    key = jax.random.PRNGKey(0)
    kx, kp1, kp2 = jax.random.split(key, 3)
    x = jax.random.normal(kx, (2, 4, 16, 16), jnp.float32)   # NCHW, like PyTorch

    # bf16-in/f32-acc MXU path vs full-f32 reference -> relaxed tolerance.
    RTOL, ATOL = 2e-2, 3e-2

    # Case 1: downsampling block (stride=2, 4 -> 8 channels) -> skip conv+BN path.
    # block_m=96 exercises multi-tile grids and zero-row padding of M.
    p1 = init_params(kp1, 4, 8)
    out1 = jax.block_until_ready(resnet_forward(x, p1, stride=2, block_m=96))
    ref1 = ref_forward(x, p1, 2)
    assert out1.shape == (2, 8, 8, 8)
    np.testing.assert_allclose(np.asarray(out1), np.asarray(ref1), rtol=RTOL, atol=ATOL)

    # Case 2: identity residual (stride=1, 4 -> 4 channels) -> identity = inputs
    p2 = init_params(kp2, 4, 4)
    out2 = jax.block_until_ready(resnet_forward(x, p2, stride=1, block_m=96))
    ref2 = ref_forward(x, p2, 1)
    assert out2.shape == (2, 4, 16, 16)
    np.testing.assert_allclose(np.asarray(out2), np.asarray(ref2), rtol=RTOL, atol=ATOL)

    print("KERNEL_OK")
</pallas_src>

<mosaic_0001>
module attributes {stable_mosaic.version = 11 : i64} {
  func.func @_conv_stats_skip_kernel(%arg0: i32, %arg1: memref<96x36xbf16, #tpu.memory_space<vmem>>, %arg2: memref<96x4xbf16, #tpu.memory_space<vmem>>, %arg3: memref<36x128xbf16, #tpu.memory_space<vmem>>, %arg4: memref<4x128xbf16, #tpu.memory_space<vmem>>, %arg5: memref<96x128xf32, #tpu.memory_space<vmem>>, %arg6: memref<96x128xf32, #tpu.memory_space<vmem>>, %arg7: memref<1x4x128xf32, #tpu.memory_space<vmem>>) attributes {dimension_semantics = [#tpu.dimension_semantics<parallel>], iteration_bounds = array<i64: 2>, scalar_prefetch = 0 : i64, scratch_operands = 0 : i64, tpu.core_type = #tpu.core_type<tc>, window_params = [{transform_indices = @transform_0, window_bounds = array<i64: 96, 36>}, {transform_indices = @transform_1, window_bounds = array<i64: 96, 4>}, {pipeline_mode = #tpu.pipeline_mode<synchronous>, transform_indices = @transform_2, window_bounds = array<i64: 36, 128>}, {pipeline_mode = #tpu.pipeline_mode<synchronous>, transform_indices = @transform_3, window_bounds = array<i64: 4, 128>}, {transform_indices = @transform_4, window_bounds = array<i64: 96, 128>}, {transform_indices = @transform_5, window_bounds = array<i64: 96, 128>}, {transform_indices = @transform_6, window_bounds = array<i64: 1, 4, 128>}]} {
    %c0 = arith.constant 0 : index
    %c0_0 = arith.constant 0 : index
    %0 = vector.load %arg1[%c0, %c0_0] : memref<96x36xbf16, #tpu.memory_space<vmem>>, vector<96x36xbf16>
    %c0_1 = arith.constant 0 : index
    %c0_2 = arith.constant 0 : index
    %1 = vector.load %arg3[%c0_1, %c0_2] : memref<36x128xbf16, #tpu.memory_space<vmem>>, vector<36x128xbf16>
    %cst = arith.constant dense<0.000000e+00> : vector<96x128xf32>
    %2 = tpu.matmul %0, %1, %cst {dimension_numbers = #tpu.dot_dimension_numbers<[1], [0], [0], [1], [0, 0, 1, 1], [], []>} : vector<96x36xbf16>, vector<36x128xbf16>, vector<96x128xf32> -> vector<96x128xf32>
    %c0_3 = arith.constant 0 : index
    %c0_4 = arith.constant 0 : index
    %3 = vector.load %arg2[%c0_3, %c0_4] : memref<96x4xbf16, #tpu.memory_space<vmem>>, vector<96x4xbf16>
    %c0_5 = arith.constant 0 : index
    %c0_6 = arith.constant 0 : index
    %4 = vector.load %arg4[%c0_5, %c0_6] : memref<4x128xbf16, #tpu.memory_space<vmem>>, vector<4x128xbf16>
    %cst_7 = arith.constant dense<0.000000e+00> : vector<96x128xf32>
    %5 = tpu.matmul %3, %4, %cst_7 {dimension_numbers = #tpu.dot_dimension_numbers<[1], [0], [0], [1], [0, 0, 1, 1], [], []>} : vector<96x4xbf16>, vector<4x128xbf16>, vector<96x128xf32> -> vector<96x128xf32>
    %c0_8 = arith.constant 0 : index
    %c0_9 = arith.constant 0 : index
    %6 = vector.load %arg5[%c0_8, %c0_9] : memref<96x128xf32, #tpu.memory_space<vmem>>, vector<96x128xf32>
    tpu.vector_store %arg5[%c0_8, %c0_9], %2 {strides = array<i32>} : memref<96x128xf32, #tpu.memory_space<vmem>>, vector<96x128xf32>,
    %c0_10 = arith.constant 0 : index
    %c0_11 = arith.constant 0 : index
    %7 = vector.load %arg6[%c0_10, %c0_11] : memref<96x128xf32, #tpu.memory_space<vmem>>, vector<96x128xf32>
    tpu.vector_store %arg6[%c0_10, %c0_11], %5 {strides = array<i32>} : memref<96x128xf32, #tpu.memory_space<vmem>>, vector<96x128xf32>,
    %cst_12 = arith.constant dense<0.000000e+00> : vector<128xf32>
    %8 = vector.multi_reduction <add>, %2, %cst_12 [0] : vector<96x128xf32> to vector<128xf32>
    %9 = vector.shape_cast %8 : vector<128xf32> to vector<1x128xf32>
    %10 = arith.mulf %2, %2 : vector<96x128xf32>
    %cst_13 = arith.constant dense<0.000000e+00> : vector<128xf32>
    %11 = vector.multi_reduction <add>, %10, %cst_13 [0] : vector<96x128xf32> to vector<128xf32>
    %12 = vector.shape_cast %11 : vector<128xf32> to vector<1x128xf32>
    %cst_14 = arith.constant dense<0.000000e+00> : vector<128xf32>
    %13 = vector.multi_reduction <add>, %5, %cst_14 [0] : vector<96x128xf32> to vector<128xf32>
    %14 = vector.shape_cast %13 : vector<128xf32> to vector<1x128xf32>
    %15 = arith.mulf %5, %5 : vector<96x128xf32>
    %cst_15 = arith.constant dense<0.000000e+00> : vector<128xf32>
    %16 = vector.multi_reduction <add>, %15, %cst_15 [0] : vector<96x128xf32> to vector<128xf32>
    %17 = vector.shape_cast %16 : vector<128xf32> to vector<1x128xf32>
    %18 = tpu.concatenate %9, %12, %14, %17 in 0 : vector<1x128xf32>, vector<1x128xf32>, vector<1x128xf32>, vector<1x128xf32> -> vector<4x128xf32>
    %c0_16 = arith.constant 0 : index
    %c0_17 = arith.constant 0 : index
    %c0_18 = arith.constant 0 : index
    %19 = vector.load %arg7[%c0_16, %c0_17, %c0_18] : memref<1x4x128xf32, #tpu.memory_space<vmem>>, vector<1x4x128xf32>
    %20 = vector.shape_cast %19 : vector<1x4x128xf32> to vector<4x128xf32>
    %21 = vector.shape_cast %18 : vector<4x128xf32> to vector<1x4x128xf32>
    tpu.vector_store %arg7[%c0_16, %c0_17, %c0_18], %21 {strides = array<i32>} : memref<1x4x128xf32, #tpu.memory_space<vmem>>, vector<1x4x128xf32>,
    return
  }
  func.func @transform_0(%arg0: i32) -> (i32, i32) {
    %c0_i32 = arith.constant 0 : i32
    %c0_i32_0 = arith.constant 0 : i32
    return %arg0, %c0_i32 : i32, i32
  }
  func.func @transform_1(%arg0: i32) -> (i32, i32) {
    %c0_i32 = arith.constant 0 : i32
    %c0_i32_0 = arith.constant 0 : i32
    return %arg0, %c0_i32 : i32, i32
  }
  func.func @transform_2(%arg0: i32) -> (i32, i32) {
    %c0_i32 = arith.constant 0 : i32
    %c0_i32_0 = arith.constant 0 : i32
    %c0_i32_1 = arith.constant 0 : i32
    return %c0_i32, %c0_i32_0 : i32, i32
  }
  func.func @transform_3(%arg0: i32) -> (i32, i32) {
    %c0_i32 = arith.constant 0 : i32
    %c0_i32_0 = arith.constant 0 : i32
    %c0_i32_1 = arith.constant 0 : i32
    return %c0_i32, %c0_i32_0 : i32, i32
  }
  func.func @transform_4(%arg0: i32) -> (i32, i32) {
    %c0_i32 = arith.constant 0 : i32
    %c0_i32_0 = arith.constant 0 : i32
    return %arg0, %c0_i32 : i32, i32
  }
  func.func @transform_5(%arg0: i32) -> (i32, i32) {
    %c0_i32 = arith.constant 0 : i32
    %c0_i32_0 = arith.constant 0 : i32
    return %arg0, %c0_i32 : i32, i32
  }
  func.func @transform_6(%arg0: i32) -> (i32, i32, i32) {
    %c0_i32 = arith.constant 0 : i32
    %c0_i32_0 = arith.constant 0 : i32
    %c0_i32_1 = arith.constant 0 : i32
    return %arg0, %c0_i32, %c0_i32_0 : i32, i32, i32
  }
}

</mosaic_0001>

<bundles_post_ra>
// kernel: tpu_custom_call.1
= control target key start
LH: loop header
LB: loop body
LE: loop exit
PB: predicated region body
PF: predicated region fallthrough
CT: control target
= control target key end

     0   :  { %s1490_s0 = inlined_call_operand.vmem [shape: bf16[192,36], index: 0, kind: input, shape index: {}]   ;;  %s1491_s1 = inlined_call_operand.vmem [shape: bf16[192,4], index: 1, kind: input, shape index: {}]   ;;  %s1492_s2 = inlined_call_operand.vmem [shape: bf16[36,128], index: 2, kind: input, shape index: {}]   ;;  %s1493_s3 = inlined_call_operand.vmem [shape: bf16[4,128], index: 3, kind: input, shape index: {}]   ;;  %s1494_s4 = inlined_call_operand.hbm [shape: f32[192,128], index: 4, kind: output, shape index: {0}]   ;;  %s1495_s5 = inlined_call_operand.hbm [shape: f32[192,128], index: 5, kind: output, shape index: {1}]   ;;  %s1496_s6 = inlined_call_operand.hbm [shape: f32[2,4,128], index: 6, kind: output, shape index: {2}]  }
   0x1   :  { %1498 = sst [smem:[#allocation9_spill]] %s1490_s0 }
   0x2   :  { %12 = vsyncpa [#allocation3], 0 }
   0x3   :  { %14 = vsyncpa [#allocation3 + $0x1], 0 }
   0x4   :  { %15 = vsyncpa [#allocation5], 0 }
   0x5   :  { %17 = vsyncpa [#allocation5 + $0x1], 0  ;;  %s1234_s21 = smov 0   ;;  %s1236_s22 = smov 0  }
   0x6   :  { %s1238_s23 = smov 0   ;;  %s1240_s24 = smov 0  }
   0x7 LB: > { %s1255_s25 = sadd.s32 4294967295, %s1192_s24   ;;  %s1497_s26 = sadd.s32 4294967294, %s1192_s24   ;;  %s1192_s24 = sphi %s1240_s24, %s1506_s24   ;;  %s1188_s23 = sphi %s1238_s23, %s1505_s23   ;;  %s1184_s22 = sphi %s1236_s22, %s1504_s22   ;;  %s1180_s21 = sphi %s1234_s21, %s1503_s21  }
   0x8   : > { %s1259_s27 = sadd.s32 1, %s1192_s24   ;;  %s124_s28 = sadd.s32 1, %s1188_s23 }
   0x9   : > { %s121_s29 = ssub.s32 %s1192_s24, %s1259_s27  ;;  %p134_p0 = scmp.ne.s32.totalorder %s1188_s23, %s1184_s22 }
   0xa   : > { %p122_p1 = scmp.eq.s32.totalorder %s121_s29, 0  ;;  %p135_p2 = scmp.eq.s32.totalorder %s1255_s25, 1 }
   0xb   : > { %p140_p3 = scmp.ne.s32.totalorder %s1184_s22, %s1180_s21  ;;  %p141_p4 = scmp.eq.s32.totalorder %s1497_s26, 1 }
   0xc   : > { %s1272_s30 = scalar_select %p122_p1, %s1188_s23, %s124_s28  }
   0xd   : > { %p1274_p5 = por %p135_p2, %p134_p0  ;;  %p1278_p6 = por %p141_p4, %p140_p3 }
   0xe   : > { %p920_p7 = scmp.ge.s32.totalorder %s1192_s24, 1  ;;  %p235_p8 = scmp.lt.s32.totalorder %s1192_s24, 3 }
  0x10   : > { %p236_p9 = pnand %p920_p7, %p235_p8 }
  0x11   : > { %s280_s13 = smul.u32 (!%p236_p9), 12, %s1255_s25  ;;  %s1501_s0 = sld [smem:[#allocation9_spill]] (!%p236_p9) }
  0x12   : > { %239 = sbr.rel (%p236_p9) target bundleno = 322 (0x142), region = 36  ;;  %s1320_s11 = sand.u32 (!%p236_p9), 1, %s1184_s22  }
  0x13   : > { %p281_p10 = scmp.lt.s32.totalorder (!%p236_p9), %s280_s13, 23  ;;  %s1009_s12 = smul.u32 (!%p236_p9), 96, %s1320_s11 }
  0x14   : > { %s734_s15 = sand.u32 (!%p236_p9), 1, %s1255_s25   ;;  %s957_s16 = smul.u32 (!%p236_p9), 1536, %s1255_s25 }
  0x15   : > { %s1327_s14 = scalar_lea.vmem (!%p236_p9), [#allocation2], %s1009_s12  ;;  %s1194_s19 = smov (!%p236_p9), [#allocation4]  }
  0x17   : > { %v1061_v0 = vld [vmem:[%s1492_s2 + $0x10] ss:$0 sps:$4 sm:$0x33]   ;;  %vm376_vm0 = vcmask 1041408   ;;  %v1062_v1 = vld [vmem:[%s1492_s2 + $0x8] sm:$0xff]   ;;  %v1063_v5 = vld [vmem:[%s1492_s2] sm:$0xff]  }
  0x18   : > { %1007 = vmatprep.subr.msk.bf16.mxu0 %vm376_vm0, %v1061_v0  ;;  %v378_v2 = vsel %vm376_vm0, %v1061_v0, 0  ;;  %v473_v3 = vld [vmem:[%s1493_s3] sm:$0x3]  ;;  %s1508_s13 = smov (!%p281_p10, %s280_s13), 23  ;;  %vm504_vm1 = vcmask 31744   ;;  %vm357_vm2 = vcmask 293888  }
  0x19   : > { %976 = vmatpush3.bf16.msra.mxu0 %v378_v2  ;;  %1008 = vmatprep.subr.msk.bf16.mxu1 %vm376_vm0, %v473_v3  ;;  %v524_v4 = vsel %vm376_vm0, %v473_v3, 0  ;;  %s922_s18 = sshll.u32 %s1508_s13, 2  ;;  %s1323_s13 = scalar_lea.vmem [#allocation4], %s1009_s12 }
  0x1a   : > { %977 = vmatprep.subr.bf16.mxu0 %v1062_v1  ;;  %994 = vmatpush3.bf16.msra.mxu1 %v524_v4  ;;  %s290_s28 = scalar_lea.vmem %s1491_s1, %s922_s18  ;;  %s284_s10 = scalar_lea.vmem %s1501_s0, %s922_s18 }
  0x1b   : > { %v1064_v6 = vld [vmem:[%s290_s28] sm:$0xff]   ;;  %v1065_v7 = vld [vmem:[%s290_s28 + $0x8] sm:$0xff]   ;;  %v1068_v10 = vld [vmem:[%s290_s28 + $0x10] sm:$0xff]   ;;  %s769_s17 = sshll.u32 %s1323_s13, 4  ;;  %s753_s18 = sshll.u32 %s1327_s14, 4  ;;  %s1368_s17 = int_to_ptr.vmem [resolvable:$true] %s769_s17  ;;  %s1382_s18 = int_to_ptr.vmem [resolvable:$true] %s753_s18 }
  0x1c   : > { %995 = vmatprep.mubr.msk.bf16.mxu1 %vm504_vm1, %v1064_v6  ;;  %v1066_v8 = vld [vmem:[%s284_s10] sm:$0xff]   ;;  %v1067_v9 = vld [vmem:[%s284_s10 + $0x8] sm:$0xff]   ;;  %v1070_v11 = vld [vmem:[%s284_s10 + $0x10] sm:$0xff]   ;;  %s1390_s12 = scalar_lea.sflag [#allocation5], %s734_s15 }
  0x1d   : > { %978 = vmatpush3.bf16.msra.mxu0 %v1062_v1  ;;  %996 = vmatmul.mubr.msk.bf16.vlgmr.msra.gmra.mxu1 %vm504_vm1, %v1065_v7  ;;  %v1069_v12 = vld [vmem:[%s290_s28 + $0x18] sm:$0xff]   ;;  %v1072_v13 = vld [vmem:[%s290_s28 + $0x20] sm:$0xff]   ;;  %v1073_v16 = vld [vmem:[%s290_s28 + $0x28] sm:$0xff]   ;;  %s1366_s28 = scalar_lea.hbm %s1495_s5, %s957_s16 }
  0x1e   : > { %979 = vmatprep.subr.bf16.mxu0 %v1063_v5  ;;  %981 = vmatprep.mubr.msk.bf16.mxu0 %vm357_vm2, %v1066_v8  ;;  %v1071_v14 = vld [vmem:[%s284_s10 + $0x18] sm:$0xff]   ;;  %v1074_v15 = vld [vmem:[%s284_s10 + $0x20] sm:$0xff]   ;;  %v1075_v17 = vld [vmem:[%s284_s10 + $0x28] sm:$0xff]   ;;  %s1380_s10 = scalar_lea.hbm %s1494_s4, %s957_s16  ;;  %s1080_s16 = sshll.u32 %s1194_s19, 4  ;;  %s1081_s16 = int_to_ptr.vmem [resolvable:$false] %s1080_s16 }
  0x1f   : > { %999 = vmatprep.mubr.msk.bf16.mxu1 %vm504_vm1, %v1068_v10  ;;  %s1082_s20 = scalar_lea.vmem %s1081_s16, 3072  ;;  %p1083_p0 = scmp.lt.s32.totalorder %s1368_s17, %s1081_s16 }
  0x21   : > { %980 = vmatpush3.bf16.msra.mxu0 %v1063_v5 }
  0x24   : > { %982 = vmatmul.mubr.msk.bf16.vlgmr.msra.gmra.mxu0 %vm357_vm2, %v1067_v9 }
  0x25   : > { %985 = vmatprep.mubr.msk.bf16.mxu0 %vm357_vm2, %v1070_v11  ;;  %1000 = vmatmul.mubr.msk.bf16.gmra.mxu1 %vm504_vm1, %v1069_v12 }
  0x26   : > { %1003 = vmatprep.mubr.msk.bf16.mxu1 %vm504_vm1, %v1072_v13 }
  0x2c   : > { %986 = vmatmul.mubr.msk.bf16.gmra.mxu0 %vm357_vm2, %v1071_v14 }
  0x2d   : > { %989 = vmatprep.mubr.msk.bf16.mxu0 %vm357_vm2, %v1074_v15  ;;  %1004 = vmatmul.mubr.msk.bf16.gmra.mxu1 %vm504_vm1, %v1073_v16 }
  0x34   : > { %990 = vmatmul.mubr.msk.bf16.gmra.mxu0 %vm357_vm2, %v1075_v17 }
  0xdd   : > { %v997_v18 = vpop.f32.mrf.mxu1 }
  0xde   : > { %621 = vst [vmem:[%s1323_s13 + $0x10] sm:$0xff] %v997_v18  ;;  %v696_v30 = vmul.f32 %v997_v18, %v997_v18 }
  0xdf   : > { %v560_v19 = vpop.f32.mrf.mxu1 }
  0xe0   : > { %619 = vst [vmem:[%s1323_s13] sm:$0xff] %v560_v19  ;;  %v694_v23 = vmul.f32 %v560_v19, %v560_v19 }
  0xe1   : > { %v998_v21 = vpop.f32.mrf.mxu1 }
  0xe2   : > { %622 = vst [vmem:[%s1323_s13 + $0x18] sm:$0xff] %v998_v21  ;;  %v697_v34 = vmul.f32 %v998_v21, %v998_v21 }
  0xe3   : > { %v563_v24 = vpop.f32.mrf.mxu1 }
  0xe4   : > { %v983_v20 = vpop.f32.mrf.mxu0  ;;  %620 = vst [vmem:[%s1323_s13 + $0x8] sm:$0xff] %v563_v24  ;;  %v677_v26 = vadd.f32 %v563_v24, %v560_v19  ;;  %v695_v27 = vmul.f32 %v563_v24, %v563_v24 }
  0xe5   : > { %609 = vst [vmem:[%s1327_s14 + $0x10] sm:$0xff] %v983_v20  ;;  %v1001_v28 = vpop.f32.mrf.mxu1  ;;  %v650_v43 = vmul.f32 %v983_v20, %v983_v20 }
  0xe6   : > { %v414_v22 = vpop.f32.mrf.mxu0  ;;  %v678_v31 = vadd.f32 %v997_v18, %v677_v26  ;;  %v706_v32 = vadd.f32 %v695_v27, %v694_v23  ;;  %625 = vst [vmem:[%s1323_s13 + $0x30] sm:$0xff] %v1001_v28  ;;  %v700_v62 = vmul.f32 %v1001_v28, %v1001_v28 }
  0xe7   : > { %607 = vst [vmem:[%s1327_s14] sm:$0xff] %v414_v22  ;;  %v648_v35 = vmul.f32 %v414_v22, %v414_v22  ;;  %v576_v37 = vpop.f32.mrf.mxu1 }
  0xe8   : > { %v984_v25 = vpop.f32.mrf.mxu0  ;;  %v707_v39 = vadd.f32 %v706_v32, %v696_v30  ;;  %623 = vst [vmem:[%s1323_s13 + $0x20] sm:$0xff] %v576_v37  ;;  %v679_v41 = vadd.f32 %v998_v21, %v678_v31  ;;  %v698_v42 = vmul.f32 %v576_v37, %v576_v37 }
  0xe9   : > { %610 = vst [vmem:[%s1327_s14 + $0x18] sm:$0xff] %v984_v25  ;;  %v1002_v45 = vpop.f32.mrf.mxu1  ;;  %v651_v50 = vmul.f32 %v984_v25, %v984_v25 }
  0xea   : > { %v417_v29 = vpop.f32.mrf.mxu0  ;;  %v680_v47 = vadd.f32 %v679_v41, %v576_v37  ;;  %v708_v48 = vadd.f32 %v707_v39, %v697_v34  ;;  %626 = vst [vmem:[%s1323_s13 + $0x38] sm:$0xff] %v1002_v45  ;;  %v701_v2 = vmul.f32 %v1002_v45, %v1002_v45 }
  0xeb   : > { %608 = vst [vmem:[%s1327_s14 + $0x8] sm:$0xff] %v417_v29  ;;  %v631_v33 = vadd.f32 %v417_v29, %v414_v22  ;;  %v649_v36 = vmul.f32 %v417_v29, %v417_v29  ;;  %v579_v52 = vpop.f32.mrf.mxu1 }
  0xec   : > { %v987_v38 = vpop.f32.mrf.mxu0  ;;  %v709_v54 = vadd.f32 %v708_v48, %v698_v42  ;;  %624 = vst [vmem:[%s1323_s13 + $0x28] sm:$0xff] %v579_v52  ;;  %v681_v56 = vadd.f32 %v680_v47, %v579_v52  ;;  %v699_v57 = vmul.f32 %v579_v52, %v579_v52 }
  0xed   : > { %v632_v40 = vadd.f32 %v983_v20, %v631_v33  ;;  %613 = vst [vmem:[%s1327_s14 + $0x30] sm:$0xff] %v987_v38  ;;  %v660_v44 = vadd.f32 %v649_v36, %v648_v35  ;;  %v1342_v60 = vpop.f32.mrf.mxu1  ;;  %v654_v11 = vmul.f32 %v987_v38, %v987_v38 }
  0xee   : > { %v430_v46 = vpop.f32.mrf.mxu0  ;;  %v682_v63 = vadd.f32 %v1001_v28, %v681_v56  ;;  %v710_v0 = vadd.f32 %v709_v54, %v699_v57  ;;  %629 = vst [vmem:[%s1323_s13 + $0x50] sm:$0xff] %v1342_v60  ;;  %v1386_v26 = vmul.f32 %v1342_v60, %v1342_v60 }
  0xef   : > { %611 = vst [vmem:[%s1327_s14 + $0x20] sm:$0xff] %v430_v46  ;;  %v633_v49 = vadd.f32 %v984_v25, %v632_v40  ;;  %v661_v51 = vadd.f32 %v660_v44, %v650_v43  ;;  %v652_v58 = vmul.f32 %v430_v46, %v430_v46  ;;  %v592_v5 = vpop.f32.mrf.mxu1 }
  0xf0   : > { %v988_v53 = vpop.f32.mrf.mxu0  ;;  %v711_v7 = vadd.f32 %v710_v0, %v700_v62  ;;  %627 = vst [vmem:[%s1323_s13 + $0x40] sm:$0xff] %v592_v5  ;;  %v683_v9 = vadd.f32 %v1002_v45, %v682_v63  ;;  %v702_v10 = vmul.f32 %v592_v5, %v592_v5 }
  0xf1   : > { %v634_v55 = vadd.f32 %v633_v49, %v430_v46  ;;  %614 = vst [vmem:[%s1327_s14 + $0x38] sm:$0xff] %v988_v53  ;;  %v662_v59 = vadd.f32 %v661_v51, %v651_v50  ;;  %v1355_v13 = vpop.f32.mrf.mxu1  ;;  %v655_v18 = vmul.f32 %v988_v53, %v988_v53 }
  0xf2   : > { %v433_v61 = vpop.f32.mrf.mxu0  ;;  %v684_v15 = vadd.f32 %v683_v9, %v592_v5  ;;  %v712_v16 = vadd.f32 %v711_v7, %v701_v2  ;;  %630 = vst [vmem:[%s1323_s13 + $0x58] sm:$0xff] %v1355_v13 }
  0xf3   : > { %612 = vst [vmem:[%s1327_s14 + $0x28] sm:$0xff] %v433_v61  ;;  %v635_v1 = vadd.f32 %v634_v55, %v433_v61  ;;  %v663_v3 = vadd.f32 %v662_v59, %v652_v58  ;;  %v653_v4 = vmul.f32 %v433_v61, %v433_v61  ;;  %v595_v20 = vpop.f32.mrf.mxu1 }
  0xf4   : > { %v1349_v6 = vpop.f32.mrf.mxu0  ;;  %v713_v22 = vadd.f32 %v712_v16, %v702_v10  ;;  %628 = vst [vmem:[%s1323_s13 + $0x48] sm:$0xff] %v595_v20  ;;  %v685_v24 = vadd.f32 %v684_v15, %v595_v20  ;;  %v703_v25 = vmul.f32 %v595_v20, %v595_v20  ;;  %s1076_s13 = scalar_lea.vmem %s1368_s17, 1536 }
  0xf5   : > { %v636_v8 = vadd.f32 %v987_v38, %v635_v1  ;;  %617 = vst [vmem:[%s1327_s14 + $0x50] sm:$0xff] %v1349_v6  ;;  %v664_v12 = vadd.f32 %v663_v3, %v653_v4  ;;  %p1077_p11 = scmp.ne.s32.totalorder %s1368_s17, %s1076_s13  ;;  %p1084_p1 = scmp.lt.s32.totalorder %s1082_s20, %s1076_s13 }
  0xf6   : > { %v446_v14 = vpop.f32.mrf.mxu0 }
  0xf7   : > { %615 = vst [vmem:[%s1327_s14 + $0x40] sm:$0xff] %v446_v14  ;;  %v637_v17 = vadd.f32 %v988_v53, %v636_v8  ;;  %v665_v19 = vadd.f32 %v664_v12, %v654_v11  ;;  %v656_v27 = vmul.f32 %v446_v14, %v446_v14  ;;  %p1078_p12 = pnand %p1077_p11, %p1274_p5  ;;  %p1085_p2 = por %p1084_p1, %p1083_p0 }
  0xf8   : > { %v1370_v21 = vpop.f32.mrf.mxu0 }
  0xf9   : > { %v638_v23 = vadd.f32 %v637_v17, %v446_v14  ;;  %618 = vst [vmem:[%s1327_s14 + $0x58] sm:$0xff] %v1370_v21  ;;  %v666_v28 = vadd.f32 %v665_v19, %v655_v18  ;;  %p1079_p13 = pneg %p1078_p12 }
  0xfa   : > { %v449_v29 = vpop.f32.mrf.mxu0 }
  0xfb   : > { %p1086_p3 = pnand %p1085_p2, %p1079_p13 }
  0xfd   : > { %1089 = shalt.err (!%p1086_p3)
}
  0xfe   : > { %s1090_s15 = scalar_lea.hbm %s1366_s28, 1536  ;;  %s1094_s19 = scalar_lea.hbm %s1495_s5, 3072 }
  0xff   : > { %p1091_p4 = scmp.ne.s32.totalorder %s1366_s28, %s1090_s15  ;;  %p1095_p9 = scmp.lt.s32.totalorder %s1366_s28, %s1495_s5 }
 0x100   : > { %p1096_p10 = scmp.lt.s32.totalorder %s1094_s19, %s1090_s15 }
 0x101   : > { %p1092_p7 = pnand %p1091_p4, %p1274_p5 }
 0x102   : > { %p1097_p11 = por %p1096_p10, %p1095_p9 }
 0x103   : > { %p1093_p8 = pneg %p1092_p7 }
 0x105   : > { %p1098_p12 = pnand %p1097_p11, %p1093_p8 }
 0x107   : > { %1101 = shalt.err (!%p1098_p12)
}
 0x108   : > { %s1195_s13 = smov 128   ;;  %s1196_s16 = smov 8   ;;  %v686_v30 = vadd.f32 %v1342_v60, %v685_v24  ;;  %v714_v31 = vadd.f32 %v713_v22, %v703_v25  ;;  %616 = vst [vmem:[%s1327_s14 + $0x48] sm:$0xff] %v449_v29  ;;  %v639_v32 = vadd.f32 %v638_v23, %v449_v29  ;;  %v657_v33 = vmul.f32 %v449_v29, %v449_v29 }
 0x109   : > { %1011 = dma.vmem_to_hbm [thread:$0]  (%p1274_p5), %s1368_s17, 1536, %s1366_s28, %s1390_s12, %s1195_s13, %s1195_s13, %s1196_s16   ;;  %v667_v34 = vadd.f32 %v666_v28, %v656_v27 }
 0x10a   : > { %s730_s0 = scalar_lea.sflag [#allocation3], %s1320_s11  ;;  %s1102_s26 = scalar_lea.vmem %s1382_s18, 1536 }
 0x10b   : > { %p1103_p13 = scmp.ne.s32.totalorder %s1382_s18, %s1102_s26  ;;  %s1197_s20 = smov [#allocation2]  }
 0x10c   : > { %s1106_s15 = sshll.u32 %s1197_s20, 4  ;;  %s1107_s15 = int_to_ptr.vmem [resolvable:$false] %s1106_s15 }
 0x10d   : > { %p1104_p0 = pnand %p1103_p13, %p1274_p5  ;;  %s1108_s29 = scalar_lea.vmem %s1107_s15, 3072 }
 0x10e   : > { %p1109_p2 = scmp.lt.s32.totalorder %s1382_s18, %s1107_s15  ;;  %p1110_p3 = scmp.lt.s32.totalorder %s1108_s29, %s1102_s26 }
 0x10f   : > { %p1105_p1 = pneg %p1104_p0 }
 0x110   : > { %p1111_p4 = por %p1110_p3, %p1109_p2 }
 0x112   : > { %p1112_p7 = pnand %p1111_p4, %p1105_p1 }
 0x114   : > { %1115 = shalt.err (!%p1112_p7)
}
 0x115   : > { %s1116_s14 = scalar_lea.hbm %s1380_s10, 1536  ;;  %s1120_s9 = scalar_lea.hbm %s1494_s4, 3072 }
 0x116   : > { %p1117_p8 = scmp.ne.s32.totalorder %s1380_s10, %s1116_s14  ;;  %p1121_p11 = scmp.lt.s32.totalorder %s1380_s10, %s1494_s4 }
 0x117   : > { %p1122_p12 = scmp.lt.s32.totalorder %s1120_s9, %s1116_s14 }
 0x118   : > { %p1118_p9 = pnand %p1117_p8, %p1274_p5 }
 0x119   : > { %p1123_p13 = por %p1122_p12, %p1121_p11 }
 0x11a   : > { %p1119_p10 = pneg %p1118_p9 }
 0x11c   : > { %p1124_p0 = pnand %p1123_p13, %p1119_p10 }
 0x11e   : > { %1127 = shalt.err (!%p1124_p0)
}
 0x11f   : > { %1010 = dma.vmem_to_hbm [thread:$0]  (%p1274_p5), %s1382_s18, 1536, %s1380_s10, %s730_s0, %s1195_s13, %s1195_s13, %s1196_s16   ;;  %v705_v35 = vmul.f32 %v1355_v13, %v1355_v13  ;;  %v687_v36 = vadd.f32 %v1355_v13, %v686_v30  ;;  %v715_v37 = vadd.f32 %v714_v31, %v1386_v26  ;;  %v640_v38 = vadd.f32 %v1349_v6, %v639_v32 }
 0x120   : > { %v658_v39 = vmul.f32 %v1349_v6, %v1349_v6  ;;  %v668_v40 = vadd.f32 %v667_v34, %v657_v33  ;;  %v659_v44 = vmul.f32 %v1370_v21, %v1370_v21  ;;  %s921_s18 = sshll.u32 %s1320_s11, 2  ;;  %vm723_vm3 = vcmask 1040384   ;;  %s954_s10 = sshll.u32 %s1255_s25, 6 }
 0x121   : > { %v688_v41 = vrot.slane %v687_v36, 4  ;;  %v716_v42 = vadd.f32 %v715_v37, %v705_v35  ;;  %v641_v43 = vadd.f32 %v1370_v21, %v640_v38  ;;  %s279_s13 = scalar_lea.vmem [#allocation6], %s921_s18  ;;  %vm726_vm4 = vcmask 1042432   ;;  %s783_s26 = scalar_lea.hbm %s1496_s6, %s954_s10 }
 0x122   : > { %v669_v45 = vadd.f32 %v668_v40, %v658_v39  ;;  %s785_s16 = sshll.u32 %s279_s13, 4  ;;  %s1198_s25 = smov [#allocation6]   ;;  %s786_s16 = int_to_ptr.vmem [resolvable:$true] %s785_s16 }
 0x123   : > { %v689_v46 = vadd.f32 %v688_v41, %v687_v36  ;;  %v717_v47 = vrot.slane %v716_v42, 4  ;;  %v642_v48 = vrot.slane %v641_v43, 4  ;;  %s1128_s15 = scalar_lea.vmem %s786_s16, 64  ;;  %s1132_s29 = sshll.u32 %s1198_s25, 4  ;;  %s1133_s29 = int_to_ptr.vmem [resolvable:$false] %s1132_s29 }
 0x124   : > { %v670_v49 = vadd.f32 %v669_v45, %v659_v44  ;;  %p1129_p1 = scmp.ne.s32.totalorder %s786_s16, %s1128_s15  ;;  %s1134_s14 = scalar_lea.vmem %s1133_s29, 128 }
 0x125   : > { %v690_v50 = vrot.slane %v689_v46, 2  ;;  %v718_v51 = vadd.f32 %v717_v47, %v716_v42  ;;  %v643_v52 = vadd.f32 %v642_v48, %v641_v43  ;;  %p1135_p4 = scmp.lt.s32.totalorder %s786_s16, %s1133_s29  ;;  %p1136_p7 = scmp.lt.s32.totalorder %s1134_s14, %s1128_s15 }
 0x126   : > { %v671_v53 = vrot.slane %v670_v49, 4  ;;  %p1130_p2 = pnand %p1129_p1, %p1274_p5 }
 0x127   : > { %v719_v54 = vrot.slane %v718_v51, 2  ;;  %v644_v55 = vrot.slane %v643_v52, 2  ;;  %v691_v57 = vadd.f32 %v690_v50, %v689_v46  ;;  %p1137_p8 = por %p1136_p7, %p1135_p4 }
 0x128   : > { %v672_v56 = vadd.f32 %v671_v53, %v670_v49  ;;  %p1131_p3 = pneg %p1130_p2 }
 0x129   : > { %v645_v58 = vadd.f32 %v644_v55, %v643_v52  ;;  %v720_v59 = vadd.f32 %v719_v54, %v718_v51  ;;  %v692_v63 = vrot.slane %v691_v57, 1 }
 0x12a   : > { %v673_v60 = vrot.slane %v672_v56, 2  ;;  %p1138_p9 = pnand %p1137_p8, %p1131_p3 }
 0x12b   : > { %v646_v61 = vrot.slane %v645_v58, 1  ;;  %v721_v1 = vrot.slane %v720_v59, 1  ;;  %v693_v4 = vadd.f32 %v692_v63, %v691_v57 }
 0x12c   : > { %v674_v62 = vadd.f32 %v673_v60, %v672_v56 }
 0x12d   : > { %v647_v2 = vadd.f32 %v646_v61, %v645_v58  ;;  %v722_v5 = vadd.f32 %v721_v1, %v720_v59 }
 0x12e   : > { %v675_v0 = vrot.slane %v674_v62, 1 }
 0x130   : > { %v676_v3 = vadd.f32 %v675_v0, %v674_v62 }
 0x132   : > { %v724_v6 = vsel %vm723_vm3, %v647_v2, %v676_v3 }
 0x133   : > { %v725_v7 = vsel %vm376_vm0, %v724_v6, %v693_v4 }
 0x134   : > { %v727_v8 = vsel %vm726_vm4, %v725_v7, %v722_v5 }
 0x135   : > { %728 = vst [vmem:[%s279_s13] sm:$0xf] %v727_v8 }
 0x136   : > { %1141 = shalt.err (!%p1138_p9)
}
 0x137   : > { %s1142_s17 = scalar_lea.hbm %s783_s26, 64  ;;  %s1146_s19 = scalar_lea.hbm %s1496_s6, 128 }
 0x138   : > { %p1143_p10 = scmp.ne.s32.totalorder %s783_s26, %s1142_s17  ;;  %p1147_p13 = scmp.lt.s32.totalorder %s783_s26, %s1496_s6 }
 0x139   : > { %p1148_p0 = scmp.lt.s32.totalorder %s1146_s19, %s1142_s17 }
 0x13a   : > { %p1144_p11 = pnand %p1143_p10, %p1274_p5 }
 0x13b   : > { %p1149_p1 = por %p1148_p0, %p1147_p13 }
 0x13c   : > { %p1145_p12 = pneg %p1144_p11 }
 0x13e   : > { %p1150_p2 = pnand %p1149_p1, %p1145_p12 }
 0x140   : > { %1153 = shalt.err (!%p1150_p2)
}
 0x141   : > { %1012 = dma.vmem_to_hbm [thread:$0]  (%p1274_p5), %s786_s16, 64, %s783_s26, %s1390_s12  }
 0x142 PF: > { %p1026_p3 = scmp.ge.s32.totalorder %s1192_s24, 2  ;;  %s797_s10 = sand.u32 1, %s1180_s21  }
 0x143   : > { %s798_s13 = scalar_lea.sflag [#allocation3], %s797_s10 }
 0x144   : > { %p1017_p4 = pnand %p1026_p3, %p1278_p6 }
 0x146   : > { %p1018_p7 = pneg %p1017_p4 }
 0x148   : > { %1171 = dma.done.wait (%p1018_p7), %s798_s13, 1536  }
 0x149   : > { %1173 = vsyncadd (%p1018_p7), %s798_s13, 4294965760  ;;  %s1502_s0 = sadd.s32 4294967294, %s1192_s24  }
 0x14a   : > { %s806_s11 = sand.u32 1, %s1502_s0  }
 0x14b   : > { %s807_s15 = scalar_lea.sflag [#allocation5], %s806_s11 }
 0x14c   : > { %1175 = dma.done.wait (%p1018_p7), %s807_s15, 1600  }
 0x14d   : > { %1177 = vsyncadd (%p1018_p7), %s807_s15, 4294965696  ;;  %p20_p5 = scmp.ge.s32.totalorder %s1259_s27, 4   ;;  %s1503_s21 = smov %s1184_s22 }
 0x14e   : > { %s1504_s22 = smov %s1188_s23  ;;  %s1505_s23 = smov %s1272_s30 }
 0x14f   : > { %s1506_s24 = smov %s1259_s27  ;;  %22 = sbr.rel (!%p20_p5) target bundleno = 7 (0x7), region = 106 }
 0x154   :  { %821 = vsyncpa [#allocation3], 1 }
 0x155   :  { %823 = vsyncpa [#allocation3 + $0x1], 1 }
 0x156   :  { %824 = vsyncpa [#allocation5], 1 }
 0x157   :  { %826 = vsyncpa [#allocation5 + $0x1], 1 }

</bundles_post_ra>
